<compile_context>
chip_gen: v7x
topology: tpu7x:2x2x1
jax: 0.10.0
libtpu: 0.0.40
codegen_flags: <defaults>
</compile_context>

<pallas_src>
import functools

import jax
import jax.numpy as jnp
from jax.experimental import pallas as pl
from jax.experimental.pallas import tpu as pltpu

HIDDEN = 256
_NEG_BIG = -1.0e30  # bias for padded logit columns; exp() underflows to 0.


def _round_up(x, m):
    return (x + m - 1) // m * m


def _policy_kernel(x_ref, w1_ref, b1_ref, w2_ref, b2_ref, w3_ref, b3_ref, o_ref):
    # Whole MLP + softmax for one batch tile; everything resident in VMEM.
    cdt = w1_ref.dtype  # matmul-input dtype (f32, or bf16 on the fast path)

    x = x_ref[...].astype(cdt)
    h1 = jnp.dot(x, w1_ref[...], preferred_element_type=jnp.float32) + b1_ref[...]
    h1 = jnp.maximum(h1, 0.0)

    h2 = jnp.dot(h1.astype(cdt), w2_ref[...], preferred_element_type=jnp.float32) + b2_ref[...]
    h2 = jnp.maximum(h2, 0.0)

    logits = jnp.dot(h2.astype(cdt), w3_ref[...], preferred_element_type=jnp.float32) + b3_ref[...]

    # Numerically-stable softmax over the (padded) action axis.  Padded columns
    # carry a -1e30 bias, so they never win the max and exp() underflows to 0,
    # leaving the normalization over the real actions only.
    m = jnp.max(logits, axis=-1, keepdims=True)
    e = jnp.exp(logits - m)
    denom = jnp.sum(e, axis=-1, keepdims=True)
    # EUP approximate reciprocal + one Newton step: co-issues with the VPU work
    # and stays within ~1e-7 relative of an exact divide.
    r = pl.reciprocal(denom, approx=True)
    r = r * (2.0 - denom * r)
    o_ref[...] = (e * r).astype(o_ref.dtype)


@functools.partial(jax.jit, static_argnames=("block_b", "use_bf16_weights"))
def policy_net_forward(state, params, *, block_b=None, use_bf16_weights=False):
    """state: [B, state_dim] float32. Returns softmax probs [B, action_dim]."""
    w1, b1, w2, b2, w3, b3 = params
    B, S = state.shape
    A = w3.shape[1]

    # Lane-dense padded sizes (last dims -> multiples of 128 lanes).
    S_pad = _round_up(S, 128)
    A_pad = _round_up(A, 128)

    # Batch tile: whole batch in one grid step when small, 256-row MXU tiles
    # (still "parallel" across steps / TensorCores) when large.
    if block_b is None:
        block_b = _round_up(B, 8) if B <= 1024 else 256
    B_pad = _round_up(B, block_b)

    f32 = jnp.float32
    wdt = jnp.bfloat16 if use_bf16_weights else f32

    x = jnp.pad(state.astype(f32), ((0, B_pad - B), (0, S_pad - S)))
    w1p = jnp.pad(w1, ((0, S_pad - S), (0, 0))).astype(wdt)
    w2p = w2.astype(wdt)
    w3p = jnp.pad(w3, ((0, 0), (0, A_pad - A))).astype(wdt)
    b1p = b1.astype(f32)
    b2p = b2.astype(f32)
    # Padded logit columns get a huge negative bias -> softmax weight exactly 0.
    b3p = jnp.pad(b3.astype(f32), ((0, 0), (0, A_pad - A)), constant_values=_NEG_BIG)

    grid = (B_pad // block_b,)
    bcast = lambda i: (0, 0)  # weights/biases are grid-invariant

    in_specs = [
        pl.BlockSpec((block_b, S_pad), lambda i: (i, 0)),   # x tile
        pl.BlockSpec((S_pad, HIDDEN), bcast),               # W1 (rows zero-padded)
        pl.BlockSpec((1, HIDDEN), bcast),                   # b1
        pl.BlockSpec((HIDDEN, HIDDEN), bcast),               # W2
        pl.BlockSpec((1, HIDDEN), bcast),                   # b2
        pl.BlockSpec((HIDDEN, A_pad), bcast),                # W3 (cols zero-padded)
        pl.BlockSpec((1, A_pad), bcast),                     # b3 (cols = -1e30)
    ]
    out_spec = pl.BlockSpec((block_b, A_pad), lambda i: (i, 0))

    out = pl.pallas_call(
        _policy_kernel,
        out_shape=jax.ShapeDtypeStruct((B_pad, A_pad), state.dtype),
        grid_spec=pltpu.PrefetchScalarGridSpec(
            num_scalar_prefetch=0,
            grid=grid,
            in_specs=in_specs,
            out_specs=out_spec,
        ),
        compiler_params=pltpu.CompilerParams(
            dimension_semantics=("parallel",),
        ),
    )(x, w1p, b1p, w2p, b2p, w3p, b3p)

    return out[:B, :A]


def init_params(key, state_dim, action_dim):
    """PyTorch-nn.Linear-style uniform(-1/sqrt(fan_in), 1/sqrt(fan_in)) init.

    Weights are stored transposed vs. PyTorch ([in, out]) so the kernel
    computes x @ W + b.
    """
    def linear(k, fan_in, fan_out):
        kw, kb = jax.random.split(k)
        bound = 1.0 / jnp.sqrt(fan_in)
        w = jax.random.uniform(kw, (fan_in, fan_out), jnp.float32, -bound, bound)
        b = jax.random.uniform(kb, (1, fan_out), jnp.float32, -bound, bound)
        return w, b

    k1, k2, k3 = jax.random.split(key, 3)
    w1, b1 = linear(k1, state_dim, HIDDEN)
    w2, b2 = linear(k2, HIDDEN, HIDDEN)
    w3, b3 = linear(k3, HIDDEN, action_dim)
    return (w1, b1, w2, b2, w3, b3)


def _reference(state, params):
    w1, b1, w2, b2, w3, b3 = params
    h1 = jnp.maximum(state @ w1 + b1, 0.0)
    h2 = jnp.maximum(h1 @ w2 + b2, 0.0)
    return jax.nn.softmax(h2 @ w3 + b3, axis=1)


if __name__ == "__main__":
    key = jax.random.PRNGKey(0)
    k_state, k_params = jax.random.split(key)

    batch, state_dim, action_dim = 16, 32, 8
    state = jax.random.normal(k_state, (batch, state_dim), jnp.float32)
    params = init_params(k_params, state_dim, action_dim)

    probs = policy_net_forward(state, params)
    jax.block_until_ready(probs)

    ref = _reference(state, params)
    assert probs.shape == (batch, action_dim)
    assert jnp.allclose(jnp.sum(probs, axis=1), 1.0, atol=1e-5)
    assert jnp.allclose(probs, ref, atol=1e-5, rtol=1e-5)

    print("KERNEL_OK")
</pallas_src>

<mosaic_0001>
module attributes {stable_mosaic.version = 11 : i64} {
  func.func @_policy_kernel(%arg0: i32, %arg1: memref<16x128xf32, #tpu.memory_space<vmem>>, %arg2: memref<128x256xf32, #tpu.memory_space<vmem>>, %arg3: memref<1x256xf32, #tpu.memory_space<vmem>>, %arg4: memref<256x256xf32, #tpu.memory_space<vmem>>, %arg5: memref<1x256xf32, #tpu.memory_space<vmem>>, %arg6: memref<256x128xf32, #tpu.memory_space<vmem>>, %arg7: memref<1x128xf32, #tpu.memory_space<vmem>>, %arg8: memref<16x128xf32, #tpu.memory_space<vmem>>) attributes {dimension_semantics = [#tpu.dimension_semantics<parallel>], iteration_bounds = array<i64: 1>, scalar_prefetch = 0 : i64, scratch_operands = 0 : i64, tpu.core_type = #tpu.core_type<tc>, window_params = [{transform_indices = @transform_0, window_bounds = array<i64: 16, 128>}, {pipeline_mode = #tpu.pipeline_mode<synchronous>, transform_indices = @transform_1, window_bounds = array<i64: 128, 256>}, {pipeline_mode = #tpu.pipeline_mode<synchronous>, transform_indices = @transform_2, window_bounds = array<i64: 1, 256>}, {pipeline_mode = #tpu.pipeline_mode<synchronous>, transform_indices = @transform_3, window_bounds = array<i64: 256, 256>}, {pipeline_mode = #tpu.pipeline_mode<synchronous>, transform_indices = @transform_4, window_bounds = array<i64: 1, 256>}, {pipeline_mode = #tpu.pipeline_mode<synchronous>, transform_indices = @transform_5, window_bounds = array<i64: 256, 128>}, {pipeline_mode = #tpu.pipeline_mode<synchronous>, transform_indices = @transform_6, window_bounds = array<i64: 1, 128>}, {transform_indices = @transform_7, window_bounds = array<i64: 16, 128>}]} {
    %c0 = arith.constant 0 : index
    %c0_0 = arith.constant 0 : index
    %0 = vector.load %arg1[%c0, %c0_0] : memref<16x128xf32, #tpu.memory_space<vmem>>, vector<16x128xf32>
    %c0_1 = arith.constant 0 : index
    %c0_2 = arith.constant 0 : index
    %1 = vector.load %arg2[%c0_1, %c0_2] : memref<128x256xf32, #tpu.memory_space<vmem>>, vector<128x256xf32>
    %cst = arith.constant dense<0.000000e+00> : vector<16x256xf32>
    %2 = tpu.matmul %0, %1, %cst {dimension_numbers = #tpu.dot_dimension_numbers<[1], [0], [0], [1], [0, 0, 1, 1], [], []>} : vector<16x128xf32>, vector<128x256xf32>, vector<16x256xf32> -> vector<16x256xf32>
    %c0_3 = arith.constant 0 : index
    %c0_4 = arith.constant 0 : index
    %3 = vector.load %arg3[%c0_3, %c0_4] : memref<1x256xf32, #tpu.memory_space<vmem>>, vector<1x256xf32>
    %4 = vector.broadcast %3 : vector<1x256xf32> to vector<16x256xf32>
    %5 = arith.addf %2, %4 : vector<16x256xf32>
    %cst_5 = arith.constant 0.000000e+00 : f32
    %6 = vector.broadcast %cst_5 : f32 to vector<16x256xf32>
    %7 = arith.maximumf %5, %6 : vector<16x256xf32>
    %c0_6 = arith.constant 0 : index
    %c0_7 = arith.constant 0 : index
    %8 = vector.load %arg4[%c0_6, %c0_7] : memref<256x256xf32, #tpu.memory_space<vmem>>, vector<256x256xf32>
    %cst_8 = arith.constant dense<0.000000e+00> : vector<16x256xf32>
    %9 = tpu.matmul %7, %8, %cst_8 {dimension_numbers = #tpu.dot_dimension_numbers<[1], [0], [0], [1], [0, 0, 1, 1], [], []>} : vector<16x256xf32>, vector<256x256xf32>, vector<16x256xf32> -> vector<16x256xf32>
    %c0_9 = arith.constant 0 : index
    %c0_10 = arith.constant 0 : index
    %10 = vector.load %arg5[%c0_9, %c0_10] : memref<1x256xf32, #tpu.memory_space<vmem>>, vector<1x256xf32>
    %11 = vector.broadcast %10 : vector<1x256xf32> to vector<16x256xf32>
    %12 = arith.addf %9, %11 : vector<16x256xf32>
    %cst_11 = arith.constant 0.000000e+00 : f32
    %13 = vector.broadcast %cst_11 : f32 to vector<16x256xf32>
    %14 = arith.maximumf %12, %13 : vector<16x256xf32>
    %c0_12 = arith.constant 0 : index
    %c0_13 = arith.constant 0 : index
    %15 = vector.load %arg6[%c0_12, %c0_13] : memref<256x128xf32, #tpu.memory_space<vmem>>, vector<256x128xf32>
    %cst_14 = arith.constant dense<0.000000e+00> : vector<16x128xf32>
    %16 = tpu.matmul %14, %15, %cst_14 {dimension_numbers = #tpu.dot_dimension_numbers<[1], [0], [0], [1], [0, 0, 1, 1], [], []>} : vector<16x256xf32>, vector<256x128xf32>, vector<16x128xf32> -> vector<16x128xf32>
    %c0_15 = arith.constant 0 : index
    %c0_16 = arith.constant 0 : index
    %17 = vector.load %arg7[%c0_15, %c0_16] : memref<1x128xf32, #tpu.memory_space<vmem>>, vector<1x128xf32>
    %18 = vector.broadcast %17 : vector<1x128xf32> to vector<16x128xf32>
    %19 = arith.addf %16, %18 : vector<16x128xf32>
    %cst_17 = arith.constant dense<0xFF800000> : vector<16xf32>
    %20 = vector.multi_reduction <maximumf>, %19, %cst_17 [1] : vector<16x128xf32> to vector<16xf32>
    %21 = vector.shape_cast %20 : vector<16xf32> to vector<16x1xf32>
    %22 = vector.broadcast %21 : vector<16x1xf32> to vector<16x128xf32>
    %23 = arith.subf %19, %22 : vector<16x128xf32>
    %24 = math.exp %23 : vector<16x128xf32>
    %cst_18 = arith.constant dense<0.000000e+00> : vector<16xf32>
    %25 = vector.multi_reduction <add>, %24, %cst_18 [1] : vector<16x128xf32> to vector<16xf32>
    %26 = vector.shape_cast %25 : vector<16xf32> to vector<16x1xf32>
    %27 = tpu.reciprocal %26 {approx = true} : vector<16x1xf32> -> vector<16x1xf32>
    %28 = arith.mulf %26, %27 : vector<16x1xf32>
    %cst_19 = arith.constant 2.000000e+00 : f32
    %29 = vector.broadcast %cst_19 : f32 to vector<16x1xf32>
    %30 = arith.subf %29, %28 : vector<16x1xf32>
    %31 = arith.mulf %27, %30 : vector<16x1xf32>
    %32 = vector.broadcast %31 : vector<16x1xf32> to vector<16x128xf32>
    %33 = arith.mulf %24, %32 : vector<16x128xf32>
    %c0_20 = arith.constant 0 : index
    %c0_21 = arith.constant 0 : index
    %34 = vector.load %arg8[%c0_20, %c0_21] : memref<16x128xf32, #tpu.memory_space<vmem>>, vector<16x128xf32>
    tpu.vector_store %arg8[%c0_20, %c0_21], %33 {strides = array<i32>} : memref<16x128xf32, #tpu.memory_space<vmem>>, vector<16x128xf32>,
    return
  }
  func.func @transform_0(%arg0: i32) -> (i32, i32) {
    %c0_i32 = arith.constant 0 : i32
    %c0_i32_0 = arith.constant 0 : i32
    return %arg0, %c0_i32 : i32, i32
  }
  func.func @transform_1(%arg0: i32) -> (i32, i32) {
    %c0_i32 = arith.constant 0 : i32
    %c0_i32_0 = arith.constant 0 : i32
    %c0_i32_1 = arith.constant 0 : i32
    return %c0_i32, %c0_i32_0 : i32, i32
  }
  func.func @transform_2(%arg0: i32) -> (i32, i32) {
    %c0_i32 = arith.constant 0 : i32
    %c0_i32_0 = arith.constant 0 : i32
    %c0_i32_1 = arith.constant 0 : i32
    return %c0_i32, %c0_i32_0 : i32, i32
  }
  func.func @transform_3(%arg0: i32) -> (i32, i32) {
    %c0_i32 = arith.constant 0 : i32
    %c0_i32_0 = arith.constant 0 : i32
    %c0_i32_1 = arith.constant 0 : i32
    return %c0_i32, %c0_i32_0 : i32, i32
  }
  func.func @transform_4(%arg0: i32) -> (i32, i32) {
    %c0_i32 = arith.constant 0 : i32
    %c0_i32_0 = arith.constant 0 : i32
    %c0_i32_1 = arith.constant 0 : i32
    return %c0_i32, %c0_i32_0 : i32, i32
  }
  func.func @transform_5(%arg0: i32) -> (i32, i32) {
    %c0_i32 = arith.constant 0 : i32
    %c0_i32_0 = arith.constant 0 : i32
    %c0_i32_1 = arith.constant 0 : i32
    return %c0_i32, %c0_i32_0 : i32, i32
  }
  func.func @transform_6(%arg0: i32) -> (i32, i32) {
    %c0_i32 = arith.constant 0 : i32
    %c0_i32_0 = arith.constant 0 : i32
    %c0_i32_1 = arith.constant 0 : i32
    return %c0_i32, %c0_i32_0 : i32, i32
  }
  func.func @transform_7(%arg0: i32) -> (i32, i32) {
    %c0_i32 = arith.constant 0 : i32
    %c0_i32_0 = arith.constant 0 : i32
    return %arg0, %c0_i32 : i32, i32
  }
}

</mosaic_0001>

<bundles_post_ra>
// kernel: policy_net_forward.1
= control target key start
LH: loop header
LB: loop body
LE: loop exit
PB: predicated region body
PF: predicated region fallthrough
CT: control target
= control target key end

     0   :  { %v630_v3 = vmov 0.0   ;;  %s1078_s1 = inlined_call_operand.vmem [shape: f32[128,256], index: 1, kind: input, shape index: {}]   ;;  %s1079_s3 = inlined_call_operand.vmem [shape: f32[256,256], index: 3, kind: input, shape index: {}]   ;;  %s1080_s0 = inlined_call_operand.vmem [shape: f32[16,128], index: 0, kind: input, shape index: {}]   ;;  %s1081_s5 = inlined_call_operand.vmem [shape: f32[256,128], index: 5, kind: input, shape index: {}]   ;;  %s1082_s2 = inlined_call_operand.vmem [shape: f32[1,256], index: 2, kind: input, shape index: {}]   ;;  %s1083_s4 = inlined_call_operand.vmem [shape: f32[1,256], index: 4, kind: input, shape index: {}]   ;;  %s1084_s6 = inlined_call_operand.vmem [shape: f32[1,128], index: 6, kind: input, shape index: {}]   ;;  %s1085_s7 = inlined_call_operand.vmem [shape: f32[16,128], index: 7, kind: output, shape index: {}]  }
   0x1   :  { %v29_v0 = vld [vmem:[%s1078_s1 + $0x8] sm:$0xff]  ;;  %v31_v1 = vld [vmem:[%s1078_s1 + $0x18] sm:$0xff]  ;;  %v28_v2 = vld [vmem:[%s1078_s1] sm:$0xff]  ;;  %136 = vmatprep.mubr.f32.mxu0 %v630_v3 }
   0x2   :  { %v493_v4 = vpack.c.bf16 %v31_v1, %v29_v0  ;;  %v30_v5 = vld [vmem:[%s1078_s1 + $0x10] sm:$0xff]  ;;  %v33_v6 = vld [vmem:[%s1078_s1 + $0x28] sm:$0xff]  ;;  %v35_v7 = vld [vmem:[%s1078_s1 + $0x38] sm:$0xff] }
   0x3   :  { %v495_v8 = vpack.c.bf16 %v30_v5, %v28_v2  ;;  %v497_v9 = vpack.c.bf16 %v35_v7, %v33_v6  ;;  %v32_v10 = vld [vmem:[%s1078_s1 + $0x20] sm:$0xff]  ;;  %v34_v11 = vld [vmem:[%s1078_s1 + $0x30] sm:$0xff]  ;;  %v37_v12 = vld [vmem:[%s1078_s1 + $0x48] sm:$0xff] }
   0x4   :  { %494 = vmatprep.subr.bf16.mxu0 %v493_v4  ;;  %v39_v13 = vld [vmem:[%s1078_s1 + $0x58] sm:$0xff]  ;;  %v499_v14 = vpack.c.bf16 %v34_v11, %v32_v10  ;;  %v36_v16 = vld [vmem:[%s1078_s1 + $0x40] sm:$0xff]  ;;  %v38_v17 = vld [vmem:[%s1078_s1 + $0x50] sm:$0xff] }
   0x5   :  { %496 = vmatpush1.bf16.msra.mxu0 %v495_v8  ;;  %v501_v15 = vpack.c.bf16 %v39_v13, %v37_v12  ;;  %v41_v18 = vld [vmem:[%s1078_s1 + $0x68] sm:$0xff]  ;;  %v43_v19 = vld [vmem:[%s1078_s1 + $0x78] sm:$0xff]  ;;  %v503_v20 = vpack.c.bf16 %v38_v17, %v36_v16  ;;  %v40_v22 = vld [vmem:[%s1078_s1 + $0x60] sm:$0xff] }
   0x6   :  { %498 = vmatprep.subr.bf16.mxu0 %v497_v9  ;;  %v505_v21 = vpack.c.bf16 %v43_v19, %v41_v18  ;;  %v42_v23 = vld [vmem:[%s1078_s1 + $0x70] sm:$0xff]  ;;  %v45_v24 = vld [vmem:[%s1078_s1 + $0x88] sm:$0xff]  ;;  %v47_v25 = vld [vmem:[%s1078_s1 + $0x98] sm:$0xff] }
   0x7   :  { %v44_v26 = vld [vmem:[%s1078_s1 + $0x80] sm:$0xff]  ;;  %v46_v27 = vld [vmem:[%s1078_s1 + $0x90] sm:$0xff]  ;;  %v154_v28 = vld [vmem:[%s1079_s3 + $0x8] sm:$0xff]  ;;  %v507_v30 = vpack.c.bf16 %v42_v23, %v40_v22  ;;  %v509_v36 = vpack.c.bf16 %v47_v25, %v45_v24 }
   0x8   :  { %v156_v29 = vld [vmem:[%s1079_s3 + $0x18] sm:$0xff]  ;;  %v49_v31 = vld [vmem:[%s1078_s1 + $0xa8] sm:$0xff]  ;;  %v153_v33 = vld [vmem:[%s1079_s3] sm:$0xff]  ;;  %v511_v46 = vpack.c.bf16 %v46_v27, %v44_v26 }
   0x9   :  { %500 = vmatpush1.bf16.msra.mxu0 %v499_v14  ;;  %v525_v32 = vpack.c.bf16 %v156_v29, %v154_v28  ;;  %v155_v34 = vld [vmem:[%s1079_s3 + $0x10] sm:$0xff]  ;;  %v158_v35 = vld [vmem:[%s1079_s3 + $0x28] sm:$0xff]  ;;  %v160_v38 = vld [vmem:[%s1079_s3 + $0x38] sm:$0xff] }
   0xa   :  { %502 = vmatprep.subr.bf16.mxu0 %v501_v15  ;;  %v527_v37 = vpack.c.bf16 %v155_v34, %v153_v33  ;;  %v157_v39 = vld [vmem:[%s1079_s3 + $0x20] sm:$0xff]  ;;  %v159_v40 = vld [vmem:[%s1079_s3 + $0x30] sm:$0xff]  ;;  %v51_v41 = vld [vmem:[%s1078_s1 + $0xb8] sm:$0xff]  ;;  %v529_v42 = vpack.c.bf16 %v160_v38, %v158_v35 }
   0xb   :  { %526 = vmatprep.subr.bf16.mxu1 %v525_v32  ;;  %v162_v43 = vld [vmem:[%s1079_s3 + $0x48] sm:$0xff]  ;;  %v164_v44 = vld [vmem:[%s1079_s3 + $0x58] sm:$0xff]  ;;  %v531_v45 = vpack.c.bf16 %v159_v40, %v157_v39  ;;  %v48_v47 = vld [vmem:[%s1078_s1 + $0xa0] sm:$0xff]  ;;  %v513_v51 = vpack.c.bf16 %v51_v41, %v49_v31 }
   0xc   :  { %528 = vmatpush1.bf16.msra.mxu1 %v527_v37  ;;  %v533_v48 = vpack.c.bf16 %v164_v44, %v162_v43  ;;  %v161_v49 = vld [vmem:[%s1079_s3 + $0x40] sm:$0xff]  ;;  %v163_v50 = vld [vmem:[%s1079_s3 + $0x50] sm:$0xff]  ;;  %v166_v53 = vld [vmem:[%s1079_s3 + $0x68] sm:$0xff] }
   0xd   :  { %504 = vmatpush1.bf16.msra.mxu0 %v503_v20  ;;  %530 = vmatprep.subr.bf16.mxu1 %v529_v42  ;;  %v50_v52 = vld [vmem:[%s1078_s1 + $0xb0] sm:$0xff]  ;;  %v168_v54 = vld [vmem:[%s1079_s3 + $0x78] sm:$0xff]  ;;  %v53_v55 = vld [vmem:[%s1078_s1 + $0xc8] sm:$0xff]  ;;  %v535_v57 = vpack.c.bf16 %v163_v50, %v161_v49 }
   0xe   :  { %506 = vmatprep.subr.bf16.mxu0 %v505_v21  ;;  %v55_v56 = vld [vmem:[%s1078_s1 + $0xd8] sm:$0xff]  ;;  %v515_v58 = vpack.c.bf16 %v50_v52, %v48_v47  ;;  %v52_v59 = vld [vmem:[%s1078_s1 + $0xc0] sm:$0xff]  ;;  %v537_v60 = vpack.c.bf16 %v168_v54, %v166_v53  ;;  %v167_v62 = vld [vmem:[%s1079_s3 + $0x70] sm:$0xff] }
   0xf   :  { %v165_v61 = vld [vmem:[%s1079_s3 + $0x60] sm:$0xff]  ;;  %v517_v63 = vpack.c.bf16 %v55_v56, %v53_v55  ;;  %v54_v0 = vld [vmem:[%s1078_s1 + $0xd0] sm:$0xff]  ;;  %v170_v1 = vld [vmem:[%s1079_s3 + $0x88] sm:$0xff] }
  0x10   :  { %532 = vmatpush1.bf16.msra.mxu1 %v531_v45  ;;  %v172_v2 = vld [vmem:[%s1079_s3 + $0x98] sm:$0xff]  ;;  %v57_v4 = vld [vmem:[%s1078_s1 + $0xe8] sm:$0xff]  ;;  %v539_v6 = vpack.c.bf16 %v167_v62, %v165_v61  ;;  %v519_v7 = vpack.c.bf16 %v54_v0, %v52_v59  ;;  %v56_v8 = vld [vmem:[%s1078_s1 + $0xe0] sm:$0xff] }
  0x11   :  { %508 = vmatpush1.bf16.msra.mxu0 %v507_v30  ;;  %534 = vmatprep.subr.bf16.mxu1 %v533_v48  ;;  %v59_v5 = vld [vmem:[%s1078_s1 + $0xf8] sm:$0xff]  ;;  %v541_v9 = vpack.c.bf16 %v172_v2, %v170_v1  ;;  %v169_v10 = vld [vmem:[%s1079_s3 + $0x80] sm:$0xff]  ;;  %v171_v11 = vld [vmem:[%s1079_s3 + $0x90] sm:$0xff] }
  0x12   :  { %510 = vmatprep.subr.bf16.mxu0 %v509_v36  ;;  %v521_v12 = vpack.c.bf16 %v59_v5, %v57_v4  ;;  %v58_v13 = vld [vmem:[%s1078_s1 + $0xf0] sm:$0xff]  ;;  %v174_v14 = vld [vmem:[%s1079_s3 + $0xa8] sm:$0xff]  ;;  %v176_v15 = vld [vmem:[%s1079_s3 + $0xb8] sm:$0xff]  ;;  %v543_v16 = vpack.c.bf16 %v171_v11, %v169_v10 }
  0x13   :  { %v523_v17 = vpack.c.bf16 %v58_v13, %v56_v8  ;;  %v545_v18 = vpack.c.bf16 %v176_v15, %v174_v14  ;;  %v173_v19 = vld [vmem:[%s1079_s3 + $0xa0] sm:$0xff]  ;;  %v175_v20 = vld [vmem:[%s1079_s3 + $0xb0] sm:$0xff]  ;;  %v178_v21 = vld [vmem:[%s1079_s3 + $0xc8] sm:$0xff] }
  0x14   :  { %536 = vmatpush1.bf16.msra.mxu1 %v535_v57  ;;  %v180_v22 = vld [vmem:[%s1079_s3 + $0xd8] sm:$0xff]  ;;  %v547_v23 = vpack.c.bf16 %v175_v20, %v173_v19  ;;  %v26_v24 = vld [vmem:[%s1080_s0] sm:$0xff]  ;;  %v179_v27 = vld [vmem:[%s1079_s3 + $0xd0] sm:$0xff] }
  0x15   :  { %512 = vmatpush1.bf16.msra.mxu0 %v511_v46  ;;  %538 = vmatprep.subr.bf16.mxu1 %v537_v60  ;;  %v549_v25 = vpack.c.bf16 %v180_v22, %v178_v21  ;;  %v177_v26 = vld [vmem:[%s1079_s3 + $0xc0] sm:$0xff]  ;;  %v182_v28 = vld [vmem:[%s1079_s3 + $0xe8] sm:$0xff]  ;;  %v184_v29 = vld [vmem:[%s1079_s3 + $0xf8] sm:$0xff] }
  0x16   :  { %514 = vmatprep.subr.bf16.mxu0 %v513_v51  ;;  %v551_v30 = vpack.c.bf16 %v179_v27, %v177_v26  ;;  %v27_v31 = vld [vmem:[%s1080_s0 + $0x8] sm:$0xff]  ;;  %v553_v32 = vpack.c.bf16 %v184_v29, %v182_v28  ;;  %v181_v33 = vld [vmem:[%s1079_s3 + $0xe0] sm:$0xff]  ;;  %v183_v34 = vld [vmem:[%s1079_s3 + $0xf0] sm:$0xff] }
  0x17   :  { %v186_v35 = vld [vmem:[%s1079_s3 + $0x108] sm:$0xff]  ;;  %v555_v36 = vpack.c.bf16 %v183_v34, %v181_v33  ;;  %v185_v38 = vld [vmem:[%s1079_s3 + $0x100] sm:$0xff]  ;;  %v187_v39 = vld [vmem:[%s1079_s3 + $0x110] sm:$0xff] }
  0x18   :  { %540 = vmatpush1.bf16.msra.mxu1 %v539_v6  ;;  %v190_v40 = vld [vmem:[%s1079_s3 + $0x128] sm:$0xff]  ;;  %v192_v41 = vld [vmem:[%s1079_s3 + $0x138] sm:$0xff]  ;;  %v559_v42 = vpack.c.bf16 %v187_v39, %v185_v38  ;;  %v189_v44 = vld [vmem:[%s1079_s3 + $0x120] sm:$0xff] }
  0x19   :  { %516 = vmatpush1.bf16.msra.mxu0 %v515_v58  ;;  %542 = vmatprep.subr.bf16.mxu1 %v541_v9  ;;  %v561_v43 = vpack.c.bf16 %v192_v41, %v190_v40  ;;  %v191_v45 = vld [vmem:[%s1079_s3 + $0x130] sm:$0xff]  ;;  %v194_v46 = vld [vmem:[%s1079_s3 + $0x148] sm:$0xff]  ;;  %v196_v47 = vld [vmem:[%s1079_s3 + $0x158] sm:$0xff] }
  0x1a   :  { %518 = vmatprep.subr.bf16.mxu0 %v517_v63  ;;  %v563_v48 = vpack.c.bf16 %v191_v45, %v189_v44  ;;  %v565_v49 = vpack.c.bf16 %v196_v47, %v194_v46  ;;  %v193_v50 = vld [vmem:[%s1079_s3 + $0x140] sm:$0xff]  ;;  %v195_v51 = vld [vmem:[%s1079_s3 + $0x150] sm:$0xff]  ;;  %v198_v52 = vld [vmem:[%s1079_s3 + $0x168] sm:$0xff] }
  0x1b   :  { %v200_v53 = vld [vmem:[%s1079_s3 + $0x178] sm:$0xff]  ;;  %v567_v54 = vpack.c.bf16 %v195_v51, %v193_v50  ;;  %v197_v56 = vld [vmem:[%s1079_s3 + $0x160] sm:$0xff]  ;;  %v199_v57 = vld [vmem:[%s1079_s3 + $0x170] sm:$0xff] }
  0x1c   :  { %544 = vmatpush1.bf16.msra.mxu1 %v543_v16  ;;  %v569_v55 = vpack.c.bf16 %v200_v53, %v198_v52  ;;  %v202_v58 = vld [vmem:[%s1079_s3 + $0x188] sm:$0xff]  ;;  %v204_v59 = vld [vmem:[%s1079_s3 + $0x198] sm:$0xff]  ;;  %v571_v60 = vpack.c.bf16 %v199_v57, %v197_v56  ;;  %v201_v62 = vld [vmem:[%s1079_s3 + $0x180] sm:$0xff] }
  0x1d   :  { %520 = vmatpush1.bf16.msra.mxu0 %v519_v7  ;;  %546 = vmatprep.subr.bf16.mxu1 %v545_v18  ;;  %v573_v61 = vpack.c.bf16 %v204_v59, %v202_v58  ;;  %v203_v63 = vld [vmem:[%s1079_s3 + $0x190] sm:$0xff]  ;;  %v206_v0 = vld [vmem:[%s1079_s3 + $0x1a8] sm:$0xff]  ;;  %v208_v1 = vld [vmem:[%s1079_s3 + $0x1b8] sm:$0xff]  ;;  %v62_v58 = vlaneseq }
  0x1e   :  { %522 = vmatprep.subr.bf16.mxu0 %v521_v12  ;;  %v575_v2 = vpack.c.bf16 %v203_v63, %v201_v62  ;;  %v577_v4 = vpack.c.bf16 %v208_v1, %v206_v0  ;;  %v205_v5 = vld [vmem:[%s1079_s3 + $0x1a0] sm:$0xff]  ;;  %v207_v6 = vld [vmem:[%s1079_s3 + $0x1b0] sm:$0xff]  ;;  %v210_v7 = vld [vmem:[%s1079_s3 + $0x1c8] sm:$0xff] }
  0x1f   :  { %v212_v8 = vld [vmem:[%s1079_s3 + $0x1d8] sm:$0xff]  ;;  %v579_v9 = vpack.c.bf16 %v207_v6, %v205_v5  ;;  %v209_v11 = vld [vmem:[%s1079_s3 + $0x1c0] sm:$0xff]  ;;  %v211_v12 = vld [vmem:[%s1079_s3 + $0x1d0] sm:$0xff]  ;;  %v63_v59 = vshrl.u32 %v62_v58, 7 }
  0x20   :  { %548 = vmatpush1.bf16.msra.mxu1 %v547_v23  ;;  %v581_v10 = vpack.c.bf16 %v212_v8, %v210_v7  ;;  %v583_v13 = vpack.c.bf16 %v211_v12, %v209_v11  ;;  %v214_v14 = vld [vmem:[%s1079_s3 + $0x1e8] sm:$0xff]  ;;  %v216_v15 = vld [vmem:[%s1079_s3 + $0x1f8] sm:$0xff]  ;;  %v215_v18 = vld [vmem:[%s1079_s3 + $0x1f0] sm:$0xff] }
  0x21   :  { %524 = vmatpush1.bf16.msra.mxu0 %v523_v17  ;;  %550 = vmatprep.subr.bf16.mxu1 %v549_v25  ;;  %v585_v16 = vpack.c.bf16 %v216_v15, %v214_v14  ;;  %v213_v17 = vld [vmem:[%s1079_s3 + $0x1e0] sm:$0xff]  ;;  %v327_v21 = vld [vmem:[%s1081_s5 + $0x88] sm:$0xff]  ;;  %v328_v25 = vld [vmem:[%s1081_s5 + $0x90] sm:$0xff]  ;;  %v68_v62 = vsub.s32 1, %v63_v59 }
  0x22   :  { %v587_v19 = vpack.c.bf16 %v215_v18, %v213_v17  ;;  %v326_v20 = vld [vmem:[%s1081_s5 + $0x80] sm:$0xff]  ;;  %v329_v26 = vld [vmem:[%s1081_s5 + $0x98] sm:$0xff]  ;;  %v312_v29 = vld [vmem:[%s1081_s5 + $0x10] sm:$0xff] }
  0x23   :  { %v310_v22 = vld [vmem:[%s1081_s5] sm:$0xff]  ;;  %v589_v23 = vpack.c.bf16 %v327_v21, %v326_v20  ;;  %v593_v28 = vpack.c.bf16 %v329_v26, %v328_v25  ;;  %v316_v40 = vld [vmem:[%s1081_s5 + $0x30] sm:$0xff]  ;;  %v317_v41 = vld [vmem:[%s1081_s5 + $0x38] sm:$0xff] }
  0x24   :  { %137 = vmatmul.mubr.f32.vlgmr.msra.gmra.mrb[0].mxu0 %v26_v24  ;;  %552 = vmatpush1.bf16.msra.mxu1 %v551_v30  ;;  %v311_v24 = vld [vmem:[%s1081_s5 + $0x8] sm:$0xff]  ;;  %v313_v30 = vld [vmem:[%s1081_s5 + $0x18] sm:$0xff]  ;;  %v603_v44 = vpack.c.bf16 %v317_v41, %v316_v40  ;;  %v318_v46 = vld [vmem:[%s1081_s5 + $0x40] sm:$0xff] }
  0x25   :  { %142 = vmatprep.mubr.f32.mxu0 %v630_v3  ;;  %v188_v3 = vld [vmem:[%s1079_s3 + $0x118] sm:$0xff]  ;;  %554 = vmatprep.subr.bf16.mxu1 %v553_v32  ;;  %v591_v27 = vpack.c.bf16 %v311_v24, %v310_v22  ;;  %v331_v32 = vld [vmem:[%s1081_s5 + $0xa8] sm:$0xff]  ;;  %v595_v33 = vpack.c.bf16 %v313_v30, %v312_v29  ;;  %v320_v52 = vld [vmem:[%s1081_s5 + $0x50] sm:$0xff] }
  0x26   :  { %v557_v37 = vpack.c.bf16 %v188_v3, %v186_v35  ;;  %590 = vmatprep.subr.bf16.mxu0 %v589_v23  ;;  %v314_v35 = vld [vmem:[%s1081_s5 + $0x20] sm:$0xff]  ;;  %v315_v3 = vld [vmem:[%s1081_s5 + $0x28] sm:$0xff]  ;;  %v321_v53 = vld [vmem:[%s1081_s5 + $0x58] sm:$0xff] }
  0x27   :  { %592 = vmatpush3.bf16.msra.mxu0 %v591_v27  ;;  %v599_v38 = vpack.c.bf16 %v315_v3, %v314_v35  ;;  %v319_v47 = vld [vmem:[%s1081_s5 + $0x48] sm:$0xff]  ;;  %v611_v56 = vpack.c.bf16 %v321_v53, %v320_v52  ;;  %v322_v14 = vld [vmem:[%s1081_s5 + $0x60] sm:$0xff]  ;;  %v340_v17 = vld [vmem:[%s1081_s5 + $0xf0] sm:$0xff] }
  0x28   :  { %143 = vmatmul.mubr.f32.gmra.mrb[2].mxu0 %v27_v31  ;;  %556 = vmatpush1.bf16.msra.mxu1 %v555_v36  ;;  %v330_v31 = vld [vmem:[%s1081_s5 + $0xa0] sm:$0xff]  ;;  %v332_v36 = vld [vmem:[%s1081_s5 + $0xb0] sm:$0xff]  ;;  %v607_v50 = vpack.c.bf16 %v319_v47, %v318_v46  ;;  %v323_v15 = vld [vmem:[%s1081_s5 + $0x68] sm:$0xff] }
  0x29   :  { %558 = vmatprep.subr.bf16.mxu1 %v557_v37  ;;  %594 = vmatprep.subr.bf16.mxu0 %v593_v28  ;;  %v597_v34 = vpack.c.bf16 %v331_v32, %v330_v31  ;;  %v333_v37 = vld [vmem:[%s1081_s5 + $0xb8] sm:$0xff]  ;;  %v324_v20 = vld [vmem:[%s1081_s5 + $0x70] sm:$0xff]  ;;  %v217_v23 = vld [vmem:[%s1083_s4] sm:$0x3] }
  0x2a   :  { %v601_v39 = vpack.c.bf16 %v333_v37, %v332_v36  ;;  %v341_v18 = vld [vmem:[%s1081_s5 + $0xf8] sm:$0xff]  ;;  %v226_v25 = vrot.slane %v217_v23, %v68_v62 }
  0x2b   :  { %596 = vmatpush3.bf16.msra.mxu0 %v595_v33  ;;  %v325_v21 = vld [vmem:[%s1081_s5 + $0x78] sm:$0xff] }
  0x2c   :  { %560 = vmatpush1.bf16.msra.mxu1 %v559_v42  ;;  %598 = vmatprep.subr.bf16.mxu0 %v597_v34  ;;  %v334_v42 = vld [vmem:[%s1081_s5 + $0xc0] sm:$0xff]  ;;  %v619_v22 = vpack.c.bf16 %v325_v21, %v324_v20 }
  0x2d   :  { %562 = vmatprep.subr.bf16.mxu1 %v561_v43  ;;  %v335_v43 = vld [vmem:[%s1081_s5 + $0xc8] sm:$0xff] }
  0x2e   :  { %v605_v45 = vpack.c.bf16 %v335_v43, %v334_v42 }
  0x2f   :  { %600 = vmatpush3.bf16.msra.mxu0 %v599_v38 }
  0x30   :  { %564 = vmatpush1.bf16.msra.mxu1 %v563_v48  ;;  %602 = vmatprep.subr.bf16.mxu0 %v601_v39  ;;  %v336_v48 = vld [vmem:[%s1081_s5 + $0xd0] sm:$0xff]  ;;  %v454_v39 = vld [vmem:[%s1084_s6] ss:$0 sm:$0xff] }
  0x31   :  { %566 = vmatprep.subr.bf16.mxu1 %v565_v49  ;;  %v337_v49 = vld [vmem:[%s1081_s5 + $0xd8] sm:$0xff] }
  0x32   :  { %v609_v51 = vpack.c.bf16 %v337_v49, %v336_v48 }
  0x33   :  { %604 = vmatpush3.bf16.msra.mxu0 %v603_v44 }
  0x34   :  { %568 = vmatpush1.bf16.msra.mxu1 %v567_v54  ;;  %606 = vmatprep.subr.bf16.mxu0 %v605_v45  ;;  %v338_v54 = vld [vmem:[%s1081_s5 + $0xe0] sm:$0xff] }
  0x35   :  { %570 = vmatprep.subr.bf16.mxu1 %v569_v55  ;;  %v339_v55 = vld [vmem:[%s1081_s5 + $0xe8] sm:$0xff] }
  0x36   :  { %v613_v57 = vpack.c.bf16 %v339_v55, %v338_v54 }
  0x37   :  { %608 = vmatpush3.bf16.msra.mxu0 %v607_v50 }
  0x38   :  { %572 = vmatpush1.bf16.msra.mxu1 %v571_v60  ;;  %610 = vmatprep.subr.bf16.mxu0 %v609_v51  ;;  %v64_v60 = vsub.s32 0, %v63_v59 }
  0x39   :  { %574 = vmatprep.subr.bf16.mxu1 %v573_v61  ;;  %v60_v61 = vld [vmem:[%s1082_s2] sm:$0x3] }
  0x3a   :  { %v65_v63 = vrot.slane %v60_v61, %v64_v60  ;;  %v69_v0 = vrot.slane %v60_v61, %v68_v62  ;;  %v222_v24 = vrot.slane %v217_v23, %v64_v60 }
  0x3b   :  { %612 = vmatpush3.bf16.msra.mxu0 %v611_v56 }
  0x3c   :  { %576 = vmatpush1.bf16.msra.mxu1 %v575_v2  ;;  %614 = vmatprep.subr.bf16.mxu0 %v613_v57 }
  0x3d   :  { %578 = vmatprep.subr.bf16.mxu1 %v577_v4 }
  0x40   :  { %580 = vmatpush1.bf16.msra.mxu1 %v579_v9 }
  0x41   :  { %582 = vmatprep.subr.bf16.mxu1 %v581_v10 }
  0x44   :  { %584 = vmatpush1.bf16.msra.mxu1 %v583_v13 }
  0x45   :  { %586 = vmatprep.subr.bf16.mxu1 %v585_v16  ;;  %v615_v16 = vpack.c.bf16 %v323_v15, %v322_v14 }
  0x47   :  { %616 = vmatpush3.bf16.msra.mxu0 %v615_v16 }
  0x48   :  { %588 = vmatpush1.bf16.msra.mxu1 %v587_v19  ;;  %v617_v19 = vpack.c.bf16 %v341_v18, %v340_v17 }
  0x4a   :  { %618 = vmatprep.subr.bf16.mxu0 %v617_v19 }
  0x4b   :  { %620 = vmatpush3.bf16.msra.mxu0 %v619_v22 }
  0xf7   :  { %v138_v1 = vpop.f32.mrb[0].mxu0 }
  0xf8   :  { %v139_v2 = vadd.f32 %v138_v1, %v65_v63  ;;  %v140_v4 = vpop.f32.mrb[1].mxu0 }
  0xf9   :  { %v141_v5 = vadd.f32 %v140_v4, %v69_v0 }
  0xfa   :  { %v149_v8 = vmax.f32 %v139_v2, 0.0 }
  0xfb   :  { %v144_v6 = vpop.f32.mrb[2].mxu0  ;;  %v150_v7 = vmax.f32 %v141_v5, 0.0 }
  0xfc   :  { %v145_v9 = vadd.f32 %v144_v6, %v65_v63  ;;  %v146_v10 = vpop.f32.mrb[3].mxu0 }
  0xfd   :  { %v147_v11 = vadd.f32 %v146_v10, %v69_v0  ;;  %293 = vmatprep.mubr.f32.mxu1 %v150_v7 }
  0xfe   :  { %294 = vmatmul.mubr.f32.vlgmr.msra.gmra.mrb[0].mxu1 %v149_v8  ;;  %v151_v13 = vmax.f32 %v145_v9, 0.0 }
  0xff   :  { %v152_v12 = vmax.f32 %v147_v11, 0.0 }
 0x101   :  { %299 = vmatprep.mubr.f32.mxu1 %v152_v12 }
 0x102   :  { %300 = vmatmul.mubr.f32.gmra.mrb[2].mxu1 %v151_v13 }
 0x1d1   :  { %v295_v26 = vpop.f32.mrb[0].mxu1 }
 0x1d2   :  { %v296_v27 = vadd.f32 %v295_v26, %v222_v24  ;;  %v297_v28 = vpop.f32.mrb[1].mxu1 }
 0x1d3   :  { %v298_v29 = vadd.f32 %v297_v28, %v226_v25 }
 0x1d4   :  { %v306_v32 = vmax.f32 %v296_v27, 0.0 }
 0x1d5   :  { %v307_v30 = vmax.f32 %v298_v29, 0.0  ;;  %v301_v31 = vpop.f32.mrb[2].mxu1 }
 0x1d6   :  { %v302_v33 = vadd.f32 %v301_v31, %v222_v24  ;;  %v303_v34 = vpop.f32.mrb[3].mxu1 }
 0x1d7   :  { %v304_v35 = vadd.f32 %v303_v34, %v226_v25  ;;  %413 = vmatprep.mubr.f32.mxu0 %v307_v30 }
 0x1d8   :  { %414 = vmatmul.mubr.f32.vlgmr.msra.gmra.mrb[4].mxu0 %v306_v32  ;;  %v308_v36 = vmax.f32 %v302_v33, 0.0 }
 0x1d9   :  { %v309_v3 = vmax.f32 %v304_v35, 0.0 }
 0x1db   :  { %418 = vmatprep.mubr.f32.mxu0 %v309_v3 }
 0x1dc   :  { %419 = vmatmul.mubr.f32.gmra.mrb[6].mxu0 %v308_v36 }
 0x2ab   :  { %v487_v37 = vpop.f32.mrb[4].mxu0 }
 0x2ac   :  { %v488_v38 = vpop.f32.mrb[5].mxu0 }
 0x2ad   :  { %v489_v40 = vadd.f32 %v488_v38, %v487_v37 }
 0x2af   :  { %v490_v41 = vpop.f32.mrb[6].mxu0  ;;  %v416_v42 = vadd.f32 %v489_v40, %v454_v39 }
 0x2b0   :  { %v491_v43 = vpop.f32.mrb[7].mxu0 }
 0x2b1   :  { %v492_v44 = vadd.f32 %v491_v43, %v490_v41  ;;  %424 = vmax.xlane.f32.xlu0 %v416_v42 }
 0x2b3   :  { %v421_v45 = vadd.f32 %v492_v44, %v454_v39 }
 0x2b5   :  { %426 = vmax.xlane.f32.xlu0 %v421_v45 }
 0x33e   :  { %v425_v46 = vpop.xlane.xlu0 %424 }
 0x33f   :  { %v428_v47 = vsub.f32 %v416_v42, %v425_v46 }
 0x341   :  { %v430_v48 = vmul.f32 1.442695, %v428_v47 }
 0x342   :  { %v427_v49 = vpop.xlane.xlu0 %426 }
 0x343   :  { %622 = vpow2.f32 %v430_v48  ;;  %v429_v50 = vsub.f32 %v421_v45, %v427_v49 }
 0x345   :  { %v432_v51 = vmul.f32 1.442695, %v429_v50 }
 0x347   :  { %624 = vpow2.f32 %v432_v51 }
 0x34d   :  { %v623_v52 = vpop.eup %622 }
 0x34e   :  { %434 = vadd.xlane.f32.xlu1 %v623_v52 }
 0x351   :  { %v625_v53 = vpop.eup %624 }
 0x352   :  { %436 = vadd.xlane.f32.xlu1 %v625_v53 }
 0x3db   :  { %v435_v54 = vpop.xlane.xlu1 %434 }
 0x3dc   :  { %626 = vrcp.f32 %v435_v54 }
 0x3df   :  { %v437_v55 = vpop.xlane.xlu1 %436 }
 0x3e0   :  { %628 = vrcp.f32 %v437_v55 }
 0x3e6   :  { %v627_v56 = vpop.eup %626 }
 0x3e7   :  { %v440_v57 = vmul.f32 %v627_v56, %v435_v54 }
 0x3e9   :  { %v442_v58 = vsub.f32 2.0, %v440_v57 }
 0x3ea   :  { %v629_v59 = vpop.eup %628 }
 0x3eb   :  { %v444_v60 = vmul.f32 %v627_v56, %v442_v58  ;;  %v441_v61 = vmul.f32 %v629_v59, %v437_v55 }
 0x3ed   :  { %v446_v62 = vmul.f32 %v623_v52, %v444_v60  ;;  %v443_v63 = vsub.f32 2.0, %v441_v61 }
 0x3ef   :  { %448 = vst [vmem:[%s1085_s7] sm:$0xff] %v446_v62  ;;  %v445_v0 = vmul.f32 %v629_v59, %v443_v63 }
 0x3f1   :  { %v447_v1 = vmul.f32 %v625_v53, %v445_v0 }
 0x3f3   :  { %449 = vst [vmem:[%s1085_s7 + $0x8] sm:$0xff] %v447_v1 }

</bundles_post_ra>
